<compile_context>
chip_gen: v6e
topology: v6e:2x2x1
jax: 0.10.0
libtpu: 0.0.40
codegen_flags: <defaults>
</compile_context>

<pallas_src>
import functools

import jax
import jax.numpy as jnp
import numpy as np
from jax import lax
from jax.experimental import pallas as pl
from jax.experimental.pallas import tpu as pltpu


# --------------------------------------------------------------------------------------
# Generation-aware VMEM budgets
# --------------------------------------------------------------------------------------
def _vmem_budgets():
    """Returns (spatial_tile_budget_bytes, vmem_limit_bytes) for the current TPU gen."""
    try:
        cap = int(pltpu.get_tpu_info().vmem_capacity_bytes)
    except Exception:
        cap = None
    if cap is None:
        cap = 64 * 2**20                       # unknown -> assume v7x-like 64 MiB / TC
    if cap >= 100 * 2**20:                     # v5e / v6e: 128 MiB physical VMEM
        return 28 * 2**20, 100 * 2**20
    return 10 * 2**20, 44 * 2**20              # v7x: leave headroom below 64 MiB


def _round_up(x, m):
    return (x + m - 1) // m * m


def _pick_spatial_tile(hw, per_lane_bytes, budget):
    """Largest lane-dense (multiple-of-128) tile within budget, plus padded HW size."""
    hw_pad = _round_up(hw, 128)
    cap = max(128, (budget // max(per_lane_bytes, 1)) // 128 * 128)
    if hw_pad <= cap:
        return hw_pad, hw_pad
    ts = int(cap)
    return ts, _round_up(hw, ts)


# --------------------------------------------------------------------------------------
# Kernels
# --------------------------------------------------------------------------------------
def _phase_matmul_kernel(x_ref, w_ref, o_ref, *, use_vpu):
    """Fused phase/channel mix: (M, Cin) @ (Cin, TS) -> (M, TS), f32 accumulation.

    x_ref: (Cin, TS) flat-spatial tile (lane dim = TS, multiple of 128)
    w_ref: (M, Cin)  with M = K*K*Cout_eff (all sub-pixel phases stacked)
    o_ref: (M, TS)
    """
    x = x_ref[...]
    w = w_ref[...]
    if use_vpu:
        # Tiny contraction dim (< 8): outer-product broadcast-FMA on the VPU.
        # Each broadcast happens exactly once per input channel (nothing left to hoist).
        cin = x.shape[0]
        acc = w[:, 0:1] * x[0:1, :]
        for ic in range(1, cin):
            acc = acc + w[:, ic:ic + 1] * x[ic:ic + 1, :]
    else:
        acc = jnp.dot(w, x, preferred_element_type=jnp.float32)
    o_ref[...] = acc.astype(o_ref.dtype)


def _direct_conv_kernel(x_ref, w_ref, o_ref, *, K, Ho, Wo):
    """General path: stride-1 direct conv, NCHW in / NCHW out.

    x_ref: (Cin, Hp, Wp)      padded (and, for stride>1, zero-upsampled) input plane
    w_ref: (Cout, K*K*Cin)    flipped, tap-major weight matrix
    o_ref: (Cout, Ho, Wo)
    """
    w = w_ref[...]

    def row_body(oy, carry):
        slab = x_ref[:, pl.ds(oy, K), :]                      # (Cin, K, Wp)
        # TODO(synk): the kw slices below are lane-unaligned VMEM copies; a polyphase
        #             formulation (as in the fast path) would avoid them entirely.
        rhs = jnp.concatenate(
            [slab[:, kh, kw:kw + Wo] for kh in range(K) for kw in range(K)],
            axis=0)                                           # (K*K*Cin, Wo)
        acc = jnp.dot(w, rhs, preferred_element_type=jnp.float32)   # (Cout, Wo)
        o_ref[:, pl.ds(oy, 1), :] = acc[:, None, :].astype(o_ref.dtype)
        return carry

    lax.fori_loop(0, Ho, row_body, 0)


# --------------------------------------------------------------------------------------
# Real-valued ConvTranspose2d wrappers
# --------------------------------------------------------------------------------------
def _conv_transpose_fast(x_nchw, weight_t, s, output_padding, tile_budget, vmem_limit):
    """Sub-pixel phase path. Requires kernel_size == stride, padding == 0."""
    N, Cin, H, W = x_nchw.shape
    _, Cout, K, _ = weight_t.shape
    HW = H * W
    M = K * K * Cout
    use_vpu = Cin < 8

    # wmat[(ph*K + pw)*Cout + oc, ic] = weight_t[ic, oc, ph, pw]
    wmat = jnp.transpose(weight_t, (2, 3, 1, 0)).reshape(M, Cin)
    x2d = x_nchw.reshape(N, Cin, HW)                 # contiguous reshape, no relayout

    per_lane_bytes = 4 * 2 * (Cin + M)               # double-buffered in + out columns
    ts, HWp = _pick_spatial_tile(HW, per_lane_bytes, tile_budget)
    if HWp != HW:
        x2d = jnp.pad(x2d, ((0, 0), (0, 0), (0, HWp - HW)))

    out = pl.pallas_call(
        functools.partial(_phase_matmul_kernel, use_vpu=use_vpu),
        out_shape=jax.ShapeDtypeStruct((N, M, HWp), jnp.float32),
        grid=(N, HWp // ts),
        in_specs=[
            pl.BlockSpec((None, Cin, ts), lambda b, t: (b, 0, t)),
            pl.BlockSpec((M, Cin), lambda b, t: (0, 0)),
        ],
        out_specs=pl.BlockSpec((None, M, ts), lambda b, t: (b, 0, t)),
        compiler_params=pltpu.CompilerParams(
            dimension_semantics=("parallel", "parallel"),
            vmem_limit_bytes=int(vmem_limit)),
    )(x2d, wmat)

    if HWp != HW:
        out = out[:, :, :HW]
    # TODO(synk): the phase interleave below is still one XLA transpose pass over the
    #             output (extra HBM read+write); doing it in-kernel needs lane-strided
    #             stores / a 5-D in-kernel relayout that Mosaic does not lower cleanly.
    out = out.reshape(N, K, K, Cout, H, W)
    out = jnp.transpose(out, (0, 3, 4, 1, 5, 2)).reshape(N, Cout, H * s, W * s)
    if output_padding:
        out = jnp.pad(out, ((0, 0), (0, 0), (0, output_padding), (0, output_padding)))
    return out


def _conv_transpose_general(x_nchw, weight_t, s, p, op, vmem_limit):
    """Fallback for stride != kernel_size or padding != 0 (padding <= K-1)."""
    N, Cin, H, W = x_nchw.shape
    _, Cout, K, _ = weight_t.shape
    pad_lo, pad_hi = K - 1 - p, K - 1 - p + op
    assert pad_lo >= 0 and pad_hi >= 0, "padding > kernel_size - 1 is not supported"
    Ho = (H - 1) * s - 2 * p + K + op
    Wo = (W - 1) * s - 2 * p + K + op

    if s == 1:
        xu = x_nchw                                   # no zero-upsample needed
    else:
        # TODO(synk): for s > 1 this still materialises the zero-upsampled intermediate
        #             in HBM; a polyphase split (as in the fast path) would remove it.
        xu = jnp.zeros((N, Cin, (H - 1) * s + 1, (W - 1) * s + 1), x_nchw.dtype)
        xu = xu.at[:, :, ::s, ::s].set(x_nchw)
    xp = jnp.pad(xu, ((0, 0), (0, 0), (pad_lo, pad_hi), (pad_lo, pad_hi)))
    Hp, Wp = xp.shape[2], xp.shape[3]

    # Direct-conv weight, tap-major: wd[oc, (kh*K+kw)*Cin + ic] = W[ic, oc, K-1-kh, K-1-kw]
    wd = jnp.transpose(weight_t[:, :, ::-1, ::-1], (1, 2, 3, 0)).reshape(Cout, K * K * Cin)

    # TODO(synk): one full (Cin, Hp, Wp) plane per image is a single block; output-row
    #             tiling with a halo'd input window would bound VMEM for large images.
    out = pl.pallas_call(
        functools.partial(_direct_conv_kernel, K=K, Ho=Ho, Wo=Wo),
        out_shape=jax.ShapeDtypeStruct((N, Cout, Ho, Wo), jnp.float32),
        grid=(N,),
        in_specs=[
            pl.BlockSpec((None, Cin, Hp, Wp), lambda b: (b, 0, 0, 0)),
            pl.BlockSpec((Cout, K * K * Cin), lambda b: (0, 0)),
        ],
        out_specs=pl.BlockSpec((None, Cout, Ho, Wo), lambda b: (b, 0, 0, 0)),
        compiler_params=pltpu.CompilerParams(
            dimension_semantics=("parallel",),
            vmem_limit_bytes=int(vmem_limit)),
    )(xp, wd)
    return out


def conv_transpose2d_pallas(x_nchw, weight_t, *, stride=1, padding=0, output_padding=0):
    """Real-valued ConvTranspose2d (groups=1, dilation=1, bias=False).

    x_nchw:   (N, Cin, H, W)      float32
    weight_t: (Cin, Cout, K, K)   float32  (PyTorch ConvTranspose2d weight layout)
    """
    s, p, op = int(stride), int(padding), int(output_padding)
    assert weight_t.ndim == 4 and weight_t.shape[2] == weight_t.shape[3]
    K = weight_t.shape[2]
    tile_budget, vmem_limit = _vmem_budgets()
    if s == K and p == 0:                             # UNet up-conv case
        return _conv_transpose_fast(x_nchw, weight_t, s, op, tile_budget, vmem_limit)
    return _conv_transpose_general(x_nchw, weight_t, s, p, op, vmem_limit)


# --------------------------------------------------------------------------------------
# ComplexConvTranspose forward
# --------------------------------------------------------------------------------------
def complex_conv_transpose(x, w_r, w_i=None, *, complex_kernel=False,
                           stride=1, padding=0, output_padding=0):
    """Forward of ComplexConvTranspose (ndims=2, groups=1, dilation=1, bias=False)."""
    xr = jnp.real(x).astype(jnp.float32)
    xi = jnp.imag(x).astype(jnp.float32)
    conv = functools.partial(conv_transpose2d_pallas, stride=stride,
                             padding=padding, output_padding=output_padding)

    if not complex_kernel:
        N = xr.shape[0]
        y = conv(jnp.concatenate([xr, xi], axis=0), w_r.astype(jnp.float32))
        return (y[:N] + 1j * y[N:]).astype(jnp.complex64)

    assert w_i is not None
    Cout = w_r.shape[1]
    w_r = w_r.astype(jnp.float32)
    w_i = w_i.astype(jnp.float32)
    # 2x2 real block form of the complex transposed conv over channels (xr, xi) -> (yr, yi):
    #   yr = conv_r(xr) - conv_i(xi);   yi = conv_i(xr) + conv_r(xi)
    # The kernel writes exactly the final real+imag planes (2*Cout channels), so no
    # extra XLA recombination pass over the output is needed.
    w_top = jnp.concatenate([w_r, w_i], axis=1)       # rows fed by xr
    w_bot = jnp.concatenate([-w_i, w_r], axis=1)      # rows fed by xi
    w_eff = jnp.concatenate([w_top, w_bot], axis=0)   # (2*Cin, 2*Cout, K, K)
    x_c = jnp.concatenate([xr, xi], axis=1)           # (N, 2*Cin, H, W)
    y = conv(x_c, w_eff)                              # (N, 2*Cout, Ho, Wo): [yr | yi]
    return (y[:, :Cout] + 1j * y[:, Cout:]).astype(jnp.complex64)


# --------------------------------------------------------------------------------------
# Pure-JAX reference (matches torch.nn.ConvTranspose2d, bias=False)
# --------------------------------------------------------------------------------------
def _ref_conv_transpose(x_nchw, weight_t, stride, padding, output_padding):
    K = weight_t.shape[2]
    w_direct = jnp.transpose(weight_t[:, :, ::-1, ::-1], (1, 0, 2, 3))   # (Cout, Cin, K, K)
    pad_lo = K - 1 - padding
    pad_hi = K - 1 - padding + output_padding
    return lax.conv_general_dilated(
        x_nchw, w_direct, window_strides=(1, 1),
        padding=[(pad_lo, pad_hi), (pad_lo, pad_hi)],
        lhs_dilation=(stride, stride),
        dimension_numbers=("NCHW", "OIHW", "NCHW"))


# --------------------------------------------------------------------------------------
# Self-test
# --------------------------------------------------------------------------------------
if __name__ == "__main__":
    key = jax.random.PRNGKey(0)
    ks = jax.random.split(key, 20)

    def init_w(k, cin, cout, ksz):
        bound = 1.0 / np.sqrt(cin * ksz * ksz)
        return jax.random.uniform(k, (cin, cout, ksz, ksz), jnp.float32, -bound, bound)

    def make_x(k1, k2, n, c, h, w):
        xr = jax.random.normal(k1, (n, c, h, w), jnp.float32)
        xi = jax.random.normal(k2, (n, c, h, w), jnp.float32)
        return xr, xi, (xr + 1j * xi).astype(jnp.complex64)

    # ---- Test 1: UNet up-conv (fast phase path), real kernel, tiny Cin (VPU branch) ----
    N, Cin, Cout, H, W, K, s = 2, 4, 4, 16, 16, 2, 2
    xr, xi, x = make_x(ks[0], ks[1], N, Cin, H, W)
    w_r = init_w(ks[2], Cin, Cout, K)
    y = jax.block_until_ready(complex_conv_transpose(x, w_r, stride=s))
    y_ref = (_ref_conv_transpose(xr, w_r, s, 0, 0)
             + 1j * _ref_conv_transpose(xi, w_r, s, 0, 0))
    assert y.shape == (N, Cout, H * s, W * s) and y.dtype == jnp.complex64
    np.testing.assert_allclose(np.asarray(y), np.asarray(y_ref), rtol=1e-4, atol=1e-4)

    # ---- Test 2: fast path, complex kernel folded in (2x2 block weight), output_padding ----
    N2, Cin2, Cout2, H2, W2, K2, s2, op2 = 2, 4, 6, 16, 16, 2, 2, 1
    xr2, xi2, x2 = make_x(ks[3], ks[4], N2, Cin2, H2, W2)
    w_r2 = init_w(ks[5], Cin2, Cout2, K2)
    w_i2 = init_w(ks[6], Cin2, Cout2, K2)
    y2 = jax.block_until_ready(
        complex_conv_transpose(x2, w_r2, w_i2, complex_kernel=True,
                               stride=s2, output_padding=op2))
    rr2 = (_ref_conv_transpose(xr2, w_r2, s2, 0, op2)
           - _ref_conv_transpose(xi2, w_i2, s2, 0, op2))
    ri2 = (_ref_conv_transpose(xi2, w_r2, s2, 0, op2)
           + _ref_conv_transpose(xr2, w_i2, s2, 0, op2))
    np.testing.assert_allclose(np.asarray(y2), np.asarray(rr2 + 1j * ri2),
                               rtol=1e-4, atol=1e-4)

    # ---- Test 3: fast path, wider channels (MXU branch) + non-128 HW (padding path) ----
    N3, Cin3, Cout3, H3, W3, K3, s3 = 2, 16, 16, 8, 8, 2, 2
    xr3, xi3, x3 = make_x(ks[7], ks[8], N3, Cin3, H3, W3)
    w_r3 = init_w(ks[9], Cin3, Cout3, K3)
    y3 = jax.block_until_ready(complex_conv_transpose(x3, w_r3, stride=s3))
    y3_ref = (_ref_conv_transpose(xr3, w_r3, s3, 0, 0)
              + 1j * _ref_conv_transpose(xi3, w_r3, s3, 0, 0))
    np.testing.assert_allclose(np.asarray(y3), np.asarray(y3_ref), rtol=1e-4, atol=1e-4)

    # ---- Test 4: general path (stride != K, padding, output_padding), complex kernel ----
    N4, Cin4, Cout4, H4, W4, K4, s4, p4, op4 = 2, 4, 4, 8, 8, 3, 2, 1, 1
    xr4, xi4, x4 = make_x(ks[10], ks[11], N4, Cin4, H4, W4)
    w_r4 = init_w(ks[12], Cin4, Cout4, K4)
    w_i4 = init_w(ks[13], Cin4, Cout4, K4)
    y4 = jax.block_until_ready(
        complex_conv_transpose(x4, w_r4, w_i4, complex_kernel=True,
                               stride=s4, padding=p4, output_padding=op4))
    rr4 = (_ref_conv_transpose(xr4, w_r4, s4, p4, op4)
           - _ref_conv_transpose(xi4, w_i4, s4, p4, op4))
    ri4 = (_ref_conv_transpose(xi4, w_r4, s4, p4, op4)
           + _ref_conv_transpose(xr4, w_i4, s4, p4, op4))
    np.testing.assert_allclose(np.asarray(y4), np.asarray(rr4 + 1j * ri4),
                               rtol=1e-4, atol=1e-4)

    # ---- Test 5: general path, stride=1 (no zero-upsample), real kernel ----
    N5, Cin5, Cout5, H5, W5, K5, p5 = 2, 8, 8, 8, 8, 3, 1
    xr5, xi5, x5 = make_x(ks[14], ks[15], N5, Cin5, H5, W5)
    w_r5 = init_w(ks[16], Cin5, Cout5, K5)
    y5 = jax.block_until_ready(complex_conv_transpose(x5, w_r5, stride=1, padding=p5))
    y5_ref = (_ref_conv_transpose(xr5, w_r5, 1, p5, 0)
              + 1j * _ref_conv_transpose(xi5, w_r5, 1, p5, 0))
    np.testing.assert_allclose(np.asarray(y5), np.asarray(y5_ref), rtol=1e-4, atol=1e-4)

    print("KERNEL_OK")
</pallas_src>

<mosaic_0001>
module attributes {stable_mosaic.version = 11 : i64} {
  func.func @_phase_matmul_kernel(%arg0: i32, %arg1: i32, %arg2: memref<1x4x256xf32, #tpu.memory_space<vmem>>, %arg3: memref<16x4xf32, #tpu.memory_space<vmem>>, %arg4: memref<1x16x256xf32, #tpu.memory_space<vmem>>) attributes {dimension_semantics = [#tpu.dimension_semantics<parallel>, #tpu.dimension_semantics<parallel>], iteration_bounds = array<i64: 4, 1>, scalar_prefetch = 0 : i64, scratch_operands = 0 : i64, tpu.core_type = #tpu.core_type<tc>, window_params = [{transform_indices = @transform_0, window_bounds = array<i64: 1, 4, 256>}, {pipeline_mode = #tpu.pipeline_mode<synchronous>, transform_indices = @transform_1, window_bounds = array<i64: 16, 4>}, {transform_indices = @transform_2, window_bounds = array<i64: 1, 16, 256>}]} {
    %c0 = arith.constant 0 : index
    %c0_0 = arith.constant 0 : index
    %c0_1 = arith.constant 0 : index
    %0 = vector.load %arg2[%c0, %c0_0, %c0_1] : memref<1x4x256xf32, #tpu.memory_space<vmem>>, vector<1x4x256xf32>
    %1 = vector.shape_cast %0 : vector<1x4x256xf32> to vector<4x256xf32>
    %c0_2 = arith.constant 0 : index
    %c0_3 = arith.constant 0 : index
    %2 = vector.load %arg3[%c0_2, %c0_3] : memref<16x4xf32, #tpu.memory_space<vmem>>, vector<16x4xf32>
    %3 = vector.extract_strided_slice %2 {offsets = [0, 0], sizes = [16, 1], strides = [1, 1]} : vector<16x4xf32> to vector<16x1xf32>
    %4 = vector.extract_strided_slice %1 {offsets = [0, 0], sizes = [1, 256], strides = [1, 1]} : vector<4x256xf32> to vector<1x256xf32>
    %5 = vector.broadcast %3 : vector<16x1xf32> to vector<16x256xf32>
    %6 = vector.broadcast %4 : vector<1x256xf32> to vector<16x256xf32>
    %7 = arith.mulf %5, %6 : vector<16x256xf32>
    %8 = vector.extract_strided_slice %2 {offsets = [0, 1], sizes = [16, 1], strides = [1, 1]} : vector<16x4xf32> to vector<16x1xf32>
    %9 = vector.extract_strided_slice %1 {offsets = [1, 0], sizes = [1, 256], strides = [1, 1]} : vector<4x256xf32> to vector<1x256xf32>
    %10 = vector.broadcast %8 : vector<16x1xf32> to vector<16x256xf32>
    %11 = vector.broadcast %9 : vector<1x256xf32> to vector<16x256xf32>
    %12 = arith.mulf %10, %11 : vector<16x256xf32>
    %13 = arith.addf %7, %12 : vector<16x256xf32>
    %14 = vector.extract_strided_slice %2 {offsets = [0, 2], sizes = [16, 1], strides = [1, 1]} : vector<16x4xf32> to vector<16x1xf32>
    %15 = vector.extract_strided_slice %1 {offsets = [2, 0], sizes = [1, 256], strides = [1, 1]} : vector<4x256xf32> to vector<1x256xf32>
    %16 = vector.broadcast %14 : vector<16x1xf32> to vector<16x256xf32>
    %17 = vector.broadcast %15 : vector<1x256xf32> to vector<16x256xf32>
    %18 = arith.mulf %16, %17 : vector<16x256xf32>
    %19 = arith.addf %13, %18 : vector<16x256xf32>
    %20 = vector.extract_strided_slice %2 {offsets = [0, 3], sizes = [16, 1], strides = [1, 1]} : vector<16x4xf32> to vector<16x1xf32>
    %21 = vector.extract_strided_slice %1 {offsets = [3, 0], sizes = [1, 256], strides = [1, 1]} : vector<4x256xf32> to vector<1x256xf32>
    %22 = vector.broadcast %20 : vector<16x1xf32> to vector<16x256xf32>
    %23 = vector.broadcast %21 : vector<1x256xf32> to vector<16x256xf32>
    %24 = arith.mulf %22, %23 : vector<16x256xf32>
    %25 = arith.addf %19, %24 : vector<16x256xf32>
    %c0_4 = arith.constant 0 : index
    %c0_5 = arith.constant 0 : index
    %c0_6 = arith.constant 0 : index
    %26 = vector.load %arg4[%c0_4, %c0_5, %c0_6] : memref<1x16x256xf32, #tpu.memory_space<vmem>>, vector<1x16x256xf32>
    %27 = vector.shape_cast %26 : vector<1x16x256xf32> to vector<16x256xf32>
    %28 = vector.shape_cast %25 : vector<16x256xf32> to vector<1x16x256xf32>
    tpu.vector_store %arg4[%c0_4, %c0_5, %c0_6], %28 {strides = array<i32>} : memref<1x16x256xf32, #tpu.memory_space<vmem>>, vector<1x16x256xf32>,
    return
  }
  func.func @transform_0(%arg0: i32, %arg1: i32) -> (i32, i32, i32) {
    %c0_i32 = arith.constant 0 : i32
    %c0_i32_0 = arith.constant 0 : i32
    return %arg0, %c0_i32, %arg1 : i32, i32, i32
  }
  func.func @transform_1(%arg0: i32, %arg1: i32) -> (i32, i32) {
    %c0_i32 = arith.constant 0 : i32
    %c0_i32_0 = arith.constant 0 : i32
    %c0_i32_1 = arith.constant 0 : i32
    return %c0_i32, %c0_i32_0 : i32, i32
  }
  func.func @transform_2(%arg0: i32, %arg1: i32) -> (i32, i32, i32) {
    %c0_i32 = arith.constant 0 : i32
    %c0_i32_0 = arith.constant 0 : i32
    return %arg0, %c0_i32, %arg1 : i32, i32, i32
  }
}

</mosaic_0001>

<bundles_post_ra>
// kernel: tpu_custom_call.1
= control target key start
LH: loop header
LB: loop body
LE: loop exit
PB: predicated region body
PF: predicated region fallthrough
CT: control target
= control target key end

     0   :  { %7 = vsyncpa [#allocation3], 0  ;;  %s802_s0 = inlined_call_operand.hbm [shape: f32[4,4,256], index: 0, kind: input, shape index: {}]   ;;  %s803_s1 = inlined_call_operand.vmem [shape: f32[16,4], index: 1, kind: input, shape index: {}]   ;;  %s804_s2 = inlined_call_operand.hbm [shape: f32[4,16,256], index: 2, kind: output, shape index: {}]  }
   0x1   :  { %9 = vsyncpa [#allocation3 + $0x1], 0 }
   0x2   :  { %10 = vsyncpa [#allocation4], 0 }
   0x3   :  { %12 = vsyncpa [#allocation4 + $0x1], 0  ;;  %s649_s9 = smov 0   ;;  %s651_s10 = smov 0  }
   0x4   :  { %s653_s11 = smov 0   ;;  %s655_s12 = smov 0  }
   0x5   :  { %s657_s13 = smov 0   ;;  %s659_s14 = smov 0  }
   0x6 LB: > { %s425_s15 = sadd.s32 4294967295, %s624_s14   ;;  %s426_s16 = sadd.s32 4294967294, %s624_s14   ;;  %s624_s14 = sphi %s659_s14, %s18_s14   ;;  %s620_s13 = sphi %s657_s13, %s815_s13   ;;  %s616_s12 = sphi %s655_s12, %s814_s12   ;;  %s612_s11 = sphi %s653_s11, %s813_s11   ;;  %s608_s10 = sphi %s651_s10, %s812_s10   ;;  %s604_s9 = sphi %s649_s9, %s811_s9  }
   0x7   : > { %s30_s17 = sadd.s32 1, %s620_s13  ;;  %s39_s18 = sadd.s32 1, %s612_s11 }
   0x8   : > { %p32_p0 = scmp.ge.s32.totalorder %s30_s17, 4  ;;  %p46_p1 = scmp.ne.s32.totalorder %s612_s11, %s608_s10 }
   0x9   : > { %p47_p2 = scmp.eq.s32.totalorder %s624_s14, 0  ;;  %p52_p3 = scmp.ne.s32.totalorder %s608_s10, %s604_s9 }
   0xa   : > { %s817_s17 = smov (%p32_p0, %s30_s17), 0  ;;  %p53_p5 = scmp.eq.s32.totalorder %s425_s15, 0 }
   0xb   : > { %p690_p4 = por %p47_p2, %p46_p1  ;;  %s34_s20 = ssub.s32 %s620_s13, %s817_s17 }
   0xc   : > { %p99_p6 = scmp.eq.s32.totalorder %s425_s15, 3  ;;  %p37_p7 = scmp.eq.s32.totalorder %s34_s20, 0 }
   0xd   : > { %p696_p8 = por %p53_p5, %p52_p3  ;;  %p105_p10 = scmp.eq.s32.totalorder %s426_s16, 3 }
   0xe   : > { %p700_p9 = por %p99_p6, %p46_p1  ;;  %p454_p12 = scmp.lt.s32.totalorder %s624_s14, 4 }
   0xf   : > { %s705_s23 = scalar_select %p37_p7, %s612_s11, %s39_s18  }
  0x10   : > { %p707_p11 = por %p105_p10, %p52_p3  ;;  %s128_s25 = sand.u32 1, %s612_s11  }
  0x11   : > { %s429_s26 = sshll.u32 %s128_s25, 3  ;;  %s440_s27 = sshll.u32 %s620_s13, 7 }
  0x12   : > { %s808_s24 = scalar_select %p707_p11, 1, 0 }
  0x13   : > { %s140_s30 = scalar_lea.hbm %s802_s0, %s440_s27  ;;  %s132_s3 = scalar_lea.vmem [#allocation2], %s429_s26 }
  0x14   : > { %s142_s4 = sshll.u32 %s132_s3, 4  ;;  %p719_p13 = pnand %p454_p12, %p690_p4  ;;  %s143_s4 = int_to_ptr.vmem [resolvable:$true] %s142_s4 }
  0x15   : > { %p432_p0 = scmp.ge.s32.totalorder %s624_s14, 1  ;;  %p147_p1 = scmp.lt.s32.totalorder %s624_s14, 5 }
  0x16   : > { %s129_s6 = scalar_lea.sflag [#allocation3], %s128_s25  ;;  %p518_p2 = pneg %p719_p13 }
  0x17   : > { %s529_s7 = scalar_lea.vmem %s143_s4, 128  ;;  %s626_s8 = smov [#allocation2]  }
  0x18   : > { %p530_p3 = scmp.ne.s32.totalorder %s143_s4, %s529_s7  ;;  %s534_s15 = sshll.u32 %s626_s8, 4  ;;  %s535_s15 = int_to_ptr.vmem [resolvable:$false] %s534_s15 }
  0x19   : > { %s536_s16 = scalar_lea.vmem %s535_s15, 256  ;;  %p537_p7 = scmp.lt.s32.totalorder %s143_s4, %s535_s15 }
  0x1a   : > { %p532_p5 = pnand %p530_p3, %p518_p2  ;;  %p538_p10 = scmp.lt.s32.totalorder %s536_s16, %s529_s7 }
  0x1c   : > { %p533_p6 = pneg %p532_p5  ;;  %p539_p4 = por %p538_p10, %p537_p7 }
  0x1e   : > { %p540_p12 = pnand %p539_p4, %p533_p6 }
  0x20   : > { %543 = shalt.err (!%p540_p12)
}
  0x21   : > { %449 = dma.hbm_to_vmem [thread:$0]  (!%p719_p13), %s140_s30, 128, %s143_s4, %s129_s6  }
  0x22   : > { %p148_p11 = pnand %p432_p0, %p147_p1 }
  0x23   : > { %s734_s18 = sand.u32 (!%p148_p11), 1, %s608_s10  }
  0x24   : > { %151 = sbr.rel (%p148_p11) target bundleno = 201 (0xc9), region = 28  ;;  %s433_s19 = sshll.u32 (!%p148_p11), %s734_s18, 3 }
  0x25   : > { %s154_s20 = scalar_lea.sflag (!%p148_p11), [#allocation3], %s734_s18  ;;  %s157_s25 = scalar_lea.vmem (!%p148_p11), [#allocation2], %s433_s19 }
  0x29   : > { %595 = dma.done.wait (%p696_p8), %s154_s20, 128  }
  0x2a   : > { %597 = vsyncadd (%p696_p8), %s154_s20, 4294967168  ;;  %v627_v0 = vmov 1   ;;  %v628_v1 = vmov 0   ;;  %v181_v2 = vld [vmem:[%s803_s1] sm:$0xff]  ;;  %v182_v3 = vld [vmem:[%s803_s1 + $0x8] sm:$0xff]  ;;  %v629_v4 = vmov 2   ;;  %v194_v6 = vlaneseq }
  0x2b   : > { %511 = vset.pattern.permute.xlu1 %v627_v0  ;;  %510 = vset.pattern.permute.xlu0 %v628_v1  ;;  %v630_v5 = vmov 3   ;;  %v180_v12 = vld [vmem:[%s157_s25] sm:$0xff]  ;;  %s434_s21 = sshll.u32 %s734_s18, 5  ;;  %s441_s4 = sshll.u32 %s616_s12, 9 }
  0x2c   : > { %217 = vperm.xlu1 %511, %v181_v2   ;;  %185 = vperm.xlu0 %510, %v181_v2   ;;  %v195_v7 = vshrl.u32 %v194_v6, 7  ;;  %s177_s30 = scalar_lea.vmem [#allocation5], %s434_s21  ;;  %s755_s12 = scalar_lea.hbm %s804_s2, %s441_s4 }
  0x2d   : > { %s338_s3 = sshll.u32 %s177_s30, 4  ;;  %s323_s7 = scalar_lea.sflag [#allocation4], %s734_s18  ;;  %s750_s3 = int_to_ptr.vmem [resolvable:$true] %s338_s3 }
  0x2e   : > { %v226_v8 = vsub.s32 1, %v195_v7  ;;  %v230_v9 = vsub.s32 5, %v195_v7  ;;  %v196_v10 = vsub.s32 0, %v195_v7  ;;  %v200_v11 = vsub.s32 4, %v195_v7  ;;  %s544_s8 = scalar_lea.vmem %s750_s3, 512  ;;  %s631_s15 = smov [#allocation5]  }
  0x2f   : > { %v260_v13 = vsub.s32 2, %v195_v7  ;;  %v264_v14 = vsub.s32 6, %v195_v7  ;;  %v294_v23 = vsub.s32 3, %v195_v7  ;;  %v298_v24 = vsub.s32 7, %v195_v7  ;;  %p545_p8 = scmp.ne.s32.totalorder %s750_s3, %s544_s8  ;;  %s548_s16 = sshll.u32 %s631_s15, 4  ;;  %s549_s16 = int_to_ptr.vmem [resolvable:$false] %s548_s16 }
  0x30   : > { %221 = vperm.xlu1 %511, %v182_v3   ;;  %190 = vperm.xlu0 %510, %v182_v3   ;;  %v227_v15 = vrot.slane %v180_v12, %v226_v8  ;;  %v231_v16 = vrot.slane %v180_v12, %v230_v9  ;;  %v197_v17 = vrot.slane %v180_v12, %v196_v10  ;;  %s550_s19 = scalar_lea.vmem %s549_s16, 1024  ;;  %p551_p0 = scmp.lt.s32.totalorder %s750_s3, %s549_s16 }
  0x31   : > { %v201_v18 = vrot.slane %v180_v12, %v200_v11  ;;  %v261_v21 = vrot.slane %v180_v12, %v260_v13  ;;  %v265_v22 = vrot.slane %v180_v12, %v264_v14  ;;  %v295_v33 = vrot.slane %v180_v12, %v294_v23  ;;  %p546_p11 = pnand %p545_p8, %p700_p9  ;;  %p552_p1 = scmp.lt.s32.totalorder %s550_s19, %s544_s8 }
  0x32   : > { %v237_v25 = vrot.slane %v227_v15, %v226_v8  ;;  %v241_v26 = vrot.slane %v231_v16, %v226_v8  ;;  %v207_v27 = vrot.slane %v197_v17, %v196_v10  ;;  %v299_v34 = vrot.slane %v180_v12, %v298_v24 }
  0x33   : > { %v211_v28 = vrot.slane %v201_v18, %v196_v10  ;;  %v271_v31 = vrot.slane %v261_v21, %v260_v13  ;;  %v275_v32 = vrot.slane %v265_v22, %v260_v13  ;;  %v305_v49 = vrot.slane %v295_v33, %v294_v23  ;;  %p547_p13 = pneg %p546_p11  ;;  %p553_p2 = por %p552_p1, %p551_p0 }
  0x34   : > { %513 = vset.pattern.permute.xlu1 %v629_v4  ;;  %512 = vset.pattern.permute.xlu0 %v629_v4  ;;  %v309_v50 = vrot.slane %v299_v34, %v294_v23 }
  0x35   : > { %255 = vperm.xlu1 %513, %v182_v3   ;;  %251 = vperm.xlu0 %512, %v181_v2   ;;  %p554_p3 = pnand %p553_p2, %p547_p13 }
  0x39   : > { %514 = vset.pattern.permute.xlu1 %v630_v5  ;;  %515 = vset.pattern.permute.xlu0 %v630_v5 }
  0x3a   : > { %285 = vperm.xlu1 %514, %v181_v2   ;;  %289 = vperm.xlu0 %515, %v182_v3  }
  0xa7   : > { %v218_v19 = vpop.permute.xlu1 %217  ;;  %v186_v20 = vpop.permute.xlu0 %185 }
  0xa8   : > { %v242_v35 = vmul.f32 %v237_v25, %v218_v19  ;;  %v243_v36 = vmul.f32 %v241_v26, %v218_v19  ;;  %v212_v37 = vmul.f32 %v207_v27, %v186_v20  ;;  %v213_v38 = vmul.f32 %v211_v28, %v186_v20 }
  0xaa   : > { %v246_v51 = vadd.f32 %v242_v35, %v212_v37  ;;  %v247_v52 = vadd.f32 %v243_v36, %v213_v38 }
  0xab   : > { %v222_v29 = vpop.permute.xlu1 %221  ;;  %v191_v30 = vpop.permute.xlu0 %190 }
  0xac   : > { %v244_v39 = vmul.f32 %v237_v25, %v222_v29  ;;  %v245_v40 = vmul.f32 %v241_v26, %v222_v29  ;;  %v214_v41 = vmul.f32 %v207_v27, %v191_v30  ;;  %v215_v42 = vmul.f32 %v211_v28, %v191_v30 }
  0xae   : > { %v248_v53 = vadd.f32 %v244_v39, %v214_v41  ;;  %v249_v54 = vadd.f32 %v245_v40, %v215_v42 }
  0xb0   : > { %v256_v43 = vpop.permute.xlu1 %255  ;;  %v252_v44 = vpop.permute.xlu0 %251 }
  0xb1   : > { %v278_v45 = vmul.f32 %v271_v31, %v256_v43  ;;  %v279_v46 = vmul.f32 %v275_v32, %v256_v43  ;;  %v276_v47 = vmul.f32 %v271_v31, %v252_v44  ;;  %v277_v48 = vmul.f32 %v275_v32, %v252_v44 }
  0xb3   : > { %v282_v55 = vadd.f32 %v278_v45, %v248_v53  ;;  %v283_v56 = vadd.f32 %v279_v46, %v249_v54  ;;  %v280_v57 = vadd.f32 %v276_v47, %v246_v51  ;;  %v281_v58 = vadd.f32 %v277_v48, %v247_v52 }
  0xb5   : > { %v286_v59 = vpop.permute.xlu1 %285  ;;  %v290_v60 = vpop.permute.xlu0 %289 }
  0xb6   : > { %v310_v61 = vmul.f32 %v305_v49, %v286_v59  ;;  %v311_v62 = vmul.f32 %v309_v50, %v286_v59  ;;  %v312_v63 = vmul.f32 %v305_v49, %v290_v60  ;;  %v313_v0 = vmul.f32 %v309_v50, %v290_v60 }
  0xb8   : > { %v314_v1 = vadd.f32 %v310_v61, %v280_v57  ;;  %v315_v2 = vadd.f32 %v311_v62, %v281_v58  ;;  %v316_v3 = vadd.f32 %v312_v63, %v282_v55  ;;  %v317_v4 = vadd.f32 %v313_v0, %v283_v56 }
  0xba   : > { %318 = vst [vmem:[%s177_s30] sm:$0xff] %v314_v1  ;;  %319 = vst [vmem:[%s177_s30 + $0x8] sm:$0xff] %v315_v2 }
  0xbb   : > { %320 = vst [vmem:[%s177_s30 + $0x10] sm:$0xff] %v316_v3  ;;  %321 = vst [vmem:[%s177_s30 + $0x18] sm:$0xff] %v317_v4 }
  0xbc   : > { %557 = shalt.err (!%p554_p3)
}
  0xbd   : > { %s558_s20 = scalar_lea.hbm %s755_s12, 512  ;;  %s562_s27 = scalar_lea.hbm %s804_s2, 2048 }
  0xbe   : > { %p559_p5 = scmp.ne.s32.totalorder %s755_s12, %s558_s20  ;;  %p563_p10 = scmp.lt.s32.totalorder %s755_s12, %s804_s2 }
  0xbf   : > { %p564_p4 = scmp.lt.s32.totalorder %s562_s27, %s558_s20 }
  0xc0   : > { %p560_p6 = pnand %p559_p5, %p700_p9 }
  0xc1   : > { %p565_p12 = por %p564_p4, %p563_p10 }
  0xc2   : > { %p561_p7 = pneg %p560_p6 }
  0xc4   : > { %p566_p8 = pnand %p565_p12, %p561_p7 }
  0xc6   : > { %569 = shalt.err (!%p566_p8)
}
  0xc7   : > { %s632_s21 = smov 256   ;;  %s633_s30 = smov 16  }
  0xc8   : > { %444 = dma.vmem_to_hbm [thread:$0]  (%p700_p9), %s750_s3, 512, %s755_s12, %s323_s7, %s632_s21, %s632_s21, %s633_s30  }
  0xc9 PF: > { %p455_p11 = scmp.ge.s32.totalorder %s624_s14, 2  ;;  %s353_s4 = sand.u32 1, %s604_s9  }
  0xca   : > { %p810_p13 = scmp.ne.s32.totalorder %s808_s24, 0  ;;  %s354_s5 = scalar_lea.sflag [#allocation4], %s353_s4 }
  0xcc   : > { %p451_p0 = pnand %p455_p11, %p810_p13 }
  0xce   : > { %p452_p1 = pneg %p451_p0 }
  0xd0   : > { %599 = dma.done.wait (%p452_p1), %s354_s5, 512  }
  0xd1   : > { %601 = vsyncadd (%p452_p1), %s354_s5, 4294966784  ;;  %s18_s14 = sadd.s32 1, %s624_s14   ;;  %s811_s9 = smov %s608_s10 }
  0xd2   : > { %p15_p2 = scmp.ge.s32.totalorder %s18_s14, 6   ;;  %s812_s10 = smov %s612_s11 }
  0xd3   : > { %s813_s11 = smov %s705_s23  ;;  %s814_s12 = smov %s620_s13 }
  0xd4   : > { %s815_s13 = smov %s817_s17  ;;  %17 = sbr.rel (!%p15_p2) target bundleno = 6 (0x6), region = 73 }
  0xd9   :  { %359 = vsyncpa [#allocation3], 1 }
  0xda   :  { %361 = vsyncpa [#allocation3 + $0x1], 1 }
  0xdb   :  { %362 = vsyncpa [#allocation4], 1 }
  0xdc   :  { %364 = vsyncpa [#allocation4 + $0x1], 1 }

</bundles_post_ra>
